<compile_context>
chip_gen: v7x
topology: tpu7x:2x2x1
jax: 0.10.0
libtpu: 0.0.40
codegen_flags: <defaults>
</compile_context>

<pallas_src>
import math
import jax
import jax.numpy as jnp
from jax import lax
from jax.experimental import pallas as pl
from jax.experimental.pallas import tpu as pltpu

# ---- problem sizes (small, consistent with the module) ----
B = 2           # batch
L = 8           # len_trim == seq len of h_q and h_kv
D_EMBED = 32    # d_embed
N_HEAD = 4      # n_head
HEAD_DIM = D_EMBED // N_HEAD
LN_EPS = 1e-5
NEG_BIG = -1e30  # finite "masked" value (avoids -inf NaN corner cases)


def cross_attention_kernel(hq_ref, hkv_ref, mask_ref, bias_ref,
                           wq_ref, wkv_ref, wo_ref,
                           bq_ref, bkv_ref, bo_ref,
                           gamma_ref, beta_ref,
                           out_ref):
    """One grid step handles TB flattened batch elements: R = TB*L rows."""
    hq = hq_ref[...]            # (R, D)
    hkv = hkv_ref[...]          # (R, D)

    # --- projections (Q separate; K|V fused into one MXU push) ---
    q = jnp.dot(hq, wq_ref[...], preferred_element_type=jnp.float32) + bq_ref[...]
    kv = jnp.dot(hkv, wkv_ref[...], preferred_element_type=jnp.float32) + bkv_ref[...]
    k = kv[:, :D_EMBED]
    v = kv[:, D_EMBED:]

    scale = 1.0 / math.sqrt(HEAD_DIM)
    bias = bias_ref[...]        # (R, R) block-diagonal causal additive mask
    wo = wo_ref[...]            # (D, D)

    dn = (((1,), (1,)), ((), ()))   # contract last dims, no batch dims

    # --- per-head attention, accumulating straight into the output projection ---
    acc = jnp.zeros((hq.shape[0], D_EMBED), jnp.float32)
    for h in range(N_HEAD):
        sl = slice(h * HEAD_DIM, (h + 1) * HEAD_DIM)
        qh, kh, vh = q[:, sl], k[:, sl], v[:, sl]
        s = lax.dot_general(qh, kh, dn,
                            preferred_element_type=jnp.float32) * scale + bias
        m = jnp.max(s, axis=-1, keepdims=True)
        p = jnp.exp(s - m)
        inv = pl.reciprocal(jnp.sum(p, axis=-1, keepdims=True), approx=True)
        oh = jnp.dot(p, vh, preferred_element_type=jnp.float32) * inv   # (R, HD)
        acc = acc + jnp.dot(oh, wo[sl, :], preferred_element_type=jnp.float32)

    attn = acc + bo_ref[...]

    # --- residual + LayerNorm (dropout == identity in eval mode) ---
    x = hq + attn
    mu = jnp.mean(x, axis=-1, keepdims=True)
    var = jnp.mean((x - mu) ** 2, axis=-1, keepdims=True)
    y = (x - mu) * lax.rsqrt(var + LN_EPS)
    y = y * gamma_ref[...] + beta_ref[...]

    # --- final elementwise mask (lane-dense, pre-broadcast in the wrapper) ---
    out_ref[...] = (y * mask_ref[...]).astype(out_ref.dtype)


def cross_attention(h_q, h_kv, mask, params, tb=None):
    (wq, wk, wv, wo, bq, bk, bv, bo, gamma, beta) = params
    Bt, Lt, D = h_q.shape

    # Rows per grid step: flatten TB batch elements so the MXU sees TB*L rows.
    # (For large B on v7x, cap TB so the grid keeps >=2 "parallel" steps to use
    #  both TensorCores; at B=2 a single step is best on all generations.)
    if tb is None:
        tb = min(Bt, max(1, 128 // Lt))
        while Bt % tb:
            tb -= 1
    R = tb * Lt
    n_steps = Bt // tb

    # Lane-friendly 2-D row slabs.
    hq2 = h_q.reshape(Bt * Lt, D)
    hkv2 = h_kv.reshape(Bt * Lt, D)
    mask2 = jnp.broadcast_to(mask, (Bt, Lt, D)).reshape(Bt * Lt, D)

    # Fused K|V projection weights / biases.
    wkv = jnp.concatenate([wk, wv], axis=1)          # (D, 2D)
    bkv = jnp.concatenate([bk, bv], axis=1)          # (1, 2D)

    # Precomputed additive attention bias over the R flattened rows of a step:
    # allow (i attends j) iff same batch element AND j <= i within the sequence.
    r = jnp.arange(R)
    same_batch = (r[:, None] // Lt) == (r[None, :] // Lt)
    causal_ok = (r[None, :] % Lt) <= (r[:, None] % Lt)
    attn_bias = jnp.where(same_batch & causal_ok, 0.0, NEG_BIG).astype(jnp.float32)

    row_spec = pl.BlockSpec((R, D), lambda i: (i, 0))
    bias_spec = pl.BlockSpec((R, R), lambda i: (0, 0))
    sq_spec = pl.BlockSpec((D, D), lambda i: (0, 0))
    wkv_spec = pl.BlockSpec((D, 2 * D), lambda i: (0, 0))
    vec_spec = pl.BlockSpec((1, D), lambda i: (0, 0))
    kvvec_spec = pl.BlockSpec((1, 2 * D), lambda i: (0, 0))

    out2 = pl.pallas_call(
        cross_attention_kernel,
        out_shape=jax.ShapeDtypeStruct((Bt * Lt, D), h_q.dtype),
        grid_spec=pltpu.PrefetchScalarGridSpec(
            num_scalar_prefetch=0,
            grid=(n_steps,),
            in_specs=[row_spec, row_spec, row_spec, bias_spec,
                      sq_spec, wkv_spec, sq_spec,
                      vec_spec, kvvec_spec, vec_spec,
                      vec_spec, vec_spec],
            out_specs=row_spec),
        compiler_params=pltpu.CompilerParams(
            dimension_semantics=("parallel",)),
    )(hq2, hkv2, mask2, attn_bias, wq, wkv, wo, bq, bkv, bo, gamma, beta)

    return out2.reshape(Bt, Lt, D)


def reference(h_q, h_kv, mask, params):
    """Pure-JAX reference mirroring torch.nn.MultiheadAttention + LayerNorm."""
    (wq, wk, wv, wo, bq, bk, bv, bo, gamma, beta) = params
    q = h_q @ wq + bq
    k = h_kv @ wk + bk
    v = h_kv @ wv + bv

    def split(x):
        return x.reshape(B, L, N_HEAD, HEAD_DIM).transpose(0, 2, 1, 3)

    qh, kh, vh = split(q), split(k), split(v)
    s = jnp.einsum('bhqd,bhkd->bhqk', qh, kh) / math.sqrt(HEAD_DIM)
    causal = jnp.triu(jnp.ones((L, L), bool), 1)
    s = jnp.where(causal, -jnp.inf, s)
    p = jax.nn.softmax(s, axis=-1)
    o = jnp.einsum('bhqk,bhkd->bhqd', p, vh).transpose(0, 2, 1, 3).reshape(B, L, D_EMBED)
    o = o @ wo + bo
    x = h_q + o
    mu = x.mean(-1, keepdims=True)
    var = ((x - mu) ** 2).mean(-1, keepdims=True)
    y = (x - mu) / jnp.sqrt(var + LN_EPS) * gamma + beta
    return y * mask


if __name__ == "__main__":
    key = jax.random.PRNGKey(0)
    ks = jax.random.split(key, 12)

    # inputs
    h_q = jax.random.normal(ks[0], (B, L, D_EMBED), jnp.float32)
    h_kv = jax.random.normal(ks[1], (B, L, D_EMBED), jnp.float32)
    mask = (jax.random.uniform(ks[2], (B, L, 1)) > 0.2).astype(jnp.float32)

    # parameters (MultiheadAttention in/out proj + LayerNorm affine),
    # weights stored pre-transposed as (D_in, D_out)
    wq = 0.05 * jax.random.normal(ks[3], (D_EMBED, D_EMBED), jnp.float32)
    wk = 0.05 * jax.random.normal(ks[4], (D_EMBED, D_EMBED), jnp.float32)
    wv = 0.05 * jax.random.normal(ks[5], (D_EMBED, D_EMBED), jnp.float32)
    wo = 0.05 * jax.random.normal(ks[6], (D_EMBED, D_EMBED), jnp.float32)
    bq = 0.01 * jax.random.normal(ks[7], (1, D_EMBED), jnp.float32)
    bk = 0.01 * jax.random.normal(ks[8], (1, D_EMBED), jnp.float32)
    bv = 0.01 * jax.random.normal(ks[9], (1, D_EMBED), jnp.float32)
    bo = 0.01 * jax.random.normal(ks[10], (1, D_EMBED), jnp.float32)
    gamma = jnp.ones((1, D_EMBED), jnp.float32)   # LayerNorm default init
    beta = jnp.zeros((1, D_EMBED), jnp.float32)

    params = (wq, wk, wv, wo, bq, bk, bv, bo, gamma, beta)

    out = cross_attention(h_q, h_kv, mask, params)
    out = jax.block_until_ready(out)

    ref = reference(h_q, h_kv, mask, params)
    assert out.shape == (B, L, D_EMBED)
    # tolerance relaxed slightly because the softmax denominator uses the
    # hardware approximate reciprocal (pl.reciprocal(approx=True))
    assert jnp.allclose(out, ref, atol=5e-3, rtol=5e-3), \
        f"max abs err {jnp.max(jnp.abs(out - ref))}"

    print("KERNEL_OK")
</pallas_src>

<mosaic_0001>
module attributes {stable_mosaic.version = 11 : i64} {
  func.func @cross_attention_kernel(%arg0: i32, %arg1: memref<16x32xf32, #tpu.memory_space<vmem>>, %arg2: memref<16x32xf32, #tpu.memory_space<vmem>>, %arg3: memref<16x32xf32, #tpu.memory_space<vmem>>, %arg4: memref<16x16xf32, #tpu.memory_space<vmem>>, %arg5: memref<32x32xf32, #tpu.memory_space<vmem>>, %arg6: memref<32x64xf32, #tpu.memory_space<vmem>>, %arg7: memref<32x32xf32, #tpu.memory_space<vmem>>, %arg8: memref<1x32xf32, #tpu.memory_space<vmem>>, %arg9: memref<1x64xf32, #tpu.memory_space<vmem>>, %arg10: memref<1x32xf32, #tpu.memory_space<vmem>>, %arg11: memref<1x32xf32, #tpu.memory_space<vmem>>, %arg12: memref<1x32xf32, #tpu.memory_space<vmem>>, %arg13: memref<16x32xf32, #tpu.memory_space<vmem>>) attributes {dimension_semantics = [#tpu.dimension_semantics<parallel>], iteration_bounds = array<i64: 1>, scalar_prefetch = 0 : i64, scratch_operands = 0 : i64, tpu.core_type = #tpu.core_type<tc>, window_params = [{transform_indices = @transform_0, window_bounds = array<i64: 16, 32>}, {transform_indices = @transform_1, window_bounds = array<i64: 16, 32>}, {transform_indices = @transform_2, window_bounds = array<i64: 16, 32>}, {pipeline_mode = #tpu.pipeline_mode<synchronous>, transform_indices = @transform_3, window_bounds = array<i64: 16, 16>}, {pipeline_mode = #tpu.pipeline_mode<synchronous>, transform_indices = @transform_4, window_bounds = array<i64: 32, 32>}, {pipeline_mode = #tpu.pipeline_mode<synchronous>, transform_indices = @transform_5, window_bounds = array<i64: 32, 64>}, {pipeline_mode = #tpu.pipeline_mode<synchronous>, transform_indices = @transform_6, window_bounds = array<i64: 32, 32>}, {pipeline_mode = #tpu.pipeline_mode<synchronous>, transform_indices = @transform_7, window_bounds = array<i64: 1, 32>}, {pipeline_mode = #tpu.pipeline_mode<synchronous>, transform_indices = @transform_8, window_bounds = array<i64: 1, 64>}, {pipeline_mode = #tpu.pipeline_mode<synchronous>, transform_indices = @transform_9, window_bounds = array<i64: 1, 32>}, {pipeline_mode = #tpu.pipeline_mode<synchronous>, transform_indices = @transform_10, window_bounds = array<i64: 1, 32>}, {pipeline_mode = #tpu.pipeline_mode<synchronous>, transform_indices = @transform_11, window_bounds = array<i64: 1, 32>}, {transform_indices = @transform_12, window_bounds = array<i64: 16, 32>}]} {
    %c0 = arith.constant 0 : index
    %c0_0 = arith.constant 0 : index
    %0 = vector.load %arg1[%c0, %c0_0] : memref<16x32xf32, #tpu.memory_space<vmem>>, vector<16x32xf32>
    %c0_1 = arith.constant 0 : index
    %c0_2 = arith.constant 0 : index
    %1 = vector.load %arg2[%c0_1, %c0_2] : memref<16x32xf32, #tpu.memory_space<vmem>>, vector<16x32xf32>
    %c0_3 = arith.constant 0 : index
    %c0_4 = arith.constant 0 : index
    %2 = vector.load %arg5[%c0_3, %c0_4] : memref<32x32xf32, #tpu.memory_space<vmem>>, vector<32x32xf32>
    %cst = arith.constant dense<0.000000e+00> : vector<16x32xf32>
    %3 = tpu.matmul %0, %2, %cst {dimension_numbers = #tpu.dot_dimension_numbers<[1], [0], [0], [1], [0, 0, 1, 1], [], []>} : vector<16x32xf32>, vector<32x32xf32>, vector<16x32xf32> -> vector<16x32xf32>
    %c0_5 = arith.constant 0 : index
    %c0_6 = arith.constant 0 : index
    %4 = vector.load %arg8[%c0_5, %c0_6] : memref<1x32xf32, #tpu.memory_space<vmem>>, vector<1x32xf32>
    %5 = vector.broadcast %4 : vector<1x32xf32> to vector<16x32xf32>
    %6 = arith.addf %3, %5 : vector<16x32xf32>
    %c0_7 = arith.constant 0 : index
    %c0_8 = arith.constant 0 : index
    %7 = vector.load %arg6[%c0_7, %c0_8] : memref<32x64xf32, #tpu.memory_space<vmem>>, vector<32x64xf32>
    %cst_9 = arith.constant dense<0.000000e+00> : vector<16x64xf32>
    %8 = tpu.matmul %1, %7, %cst_9 {dimension_numbers = #tpu.dot_dimension_numbers<[1], [0], [0], [1], [0, 0, 1, 1], [], []>} : vector<16x32xf32>, vector<32x64xf32>, vector<16x64xf32> -> vector<16x64xf32>
    %c0_10 = arith.constant 0 : index
    %c0_11 = arith.constant 0 : index
    %9 = vector.load %arg9[%c0_10, %c0_11] : memref<1x64xf32, #tpu.memory_space<vmem>>, vector<1x64xf32>
    %10 = vector.broadcast %9 : vector<1x64xf32> to vector<16x64xf32>
    %11 = arith.addf %8, %10 : vector<16x64xf32>
    %12 = vector.extract_strided_slice %11 {offsets = [0, 0], sizes = [16, 32], strides = [1, 1]} : vector<16x64xf32> to vector<16x32xf32>
    %13 = vector.extract_strided_slice %11 {offsets = [0, 32], sizes = [16, 32], strides = [1, 1]} : vector<16x64xf32> to vector<16x32xf32>
    %c0_12 = arith.constant 0 : index
    %c0_13 = arith.constant 0 : index
    %14 = vector.load %arg4[%c0_12, %c0_13] : memref<16x16xf32, #tpu.memory_space<vmem>>, vector<16x16xf32>
    %c0_14 = arith.constant 0 : index
    %c0_15 = arith.constant 0 : index
    %15 = vector.load %arg7[%c0_14, %c0_15] : memref<32x32xf32, #tpu.memory_space<vmem>>, vector<32x32xf32>
    %cst_16 = arith.constant 0.000000e+00 : f32
    %16 = vector.broadcast %cst_16 : f32 to vector<16x32xf32>
    %17 = vector.extract_strided_slice %6 {offsets = [0, 0], sizes = [16, 8], strides = [1, 1]} : vector<16x32xf32> to vector<16x8xf32>
    %18 = vector.extract_strided_slice %12 {offsets = [0, 0], sizes = [16, 8], strides = [1, 1]} : vector<16x32xf32> to vector<16x8xf32>
    %19 = vector.extract_strided_slice %13 {offsets = [0, 0], sizes = [16, 8], strides = [1, 1]} : vector<16x32xf32> to vector<16x8xf32>
    %cst_17 = arith.constant dense<0.000000e+00> : vector<16x16xf32>
    %20 = tpu.matmul %17, %18, %cst_17 {dimension_numbers = #tpu.dot_dimension_numbers<[1], [1], [0], [0], [0, 0, 1, 0], [], []>} : vector<16x8xf32>, vector<16x8xf32>, vector<16x16xf32> -> vector<16x16xf32>
    %cst_18 = arith.constant 0.353553385 : f32
    %21 = vector.broadcast %cst_18 : f32 to vector<16x16xf32>
    %22 = arith.mulf %20, %21 : vector<16x16xf32>
    %23 = arith.addf %22, %14 : vector<16x16xf32>
    %cst_19 = arith.constant dense<0xFF800000> : vector<16xf32>
    %24 = vector.multi_reduction <maximumf>, %23, %cst_19 [1] : vector<16x16xf32> to vector<16xf32>
    %25 = vector.shape_cast %24 : vector<16xf32> to vector<16x1xf32>
    %26 = vector.broadcast %25 : vector<16x1xf32> to vector<16x16xf32>
    %27 = arith.subf %23, %26 : vector<16x16xf32>
    %28 = math.exp %27 : vector<16x16xf32>
    %cst_20 = arith.constant dense<0.000000e+00> : vector<16xf32>
    %29 = vector.multi_reduction <add>, %28, %cst_20 [1] : vector<16x16xf32> to vector<16xf32>
    %30 = vector.shape_cast %29 : vector<16xf32> to vector<16x1xf32>
    %31 = tpu.reciprocal %30 {approx = true} : vector<16x1xf32> -> vector<16x1xf32>
    %cst_21 = arith.constant dense<0.000000e+00> : vector<16x8xf32>
    %32 = tpu.matmul %28, %19, %cst_21 {dimension_numbers = #tpu.dot_dimension_numbers<[1], [0], [0], [1], [0, 0, 1, 1], [], []>} : vector<16x16xf32>, vector<16x8xf32>, vector<16x8xf32> -> vector<16x8xf32>
    %33 = vector.broadcast %31 : vector<16x1xf32> to vector<16x8xf32>
    %34 = arith.mulf %32, %33 : vector<16x8xf32>
    %35 = vector.extract_strided_slice %15 {offsets = [0, 0], sizes = [8, 32], strides = [1, 1]} : vector<32x32xf32> to vector<8x32xf32>
    %cst_22 = arith.constant dense<0.000000e+00> : vector<16x32xf32>
    %36 = tpu.matmul %34, %35, %cst_22 {dimension_numbers = #tpu.dot_dimension_numbers<[1], [0], [0], [1], [0, 0, 1, 1], [], []>} : vector<16x8xf32>, vector<8x32xf32>, vector<16x32xf32> -> vector<16x32xf32>
    %37 = arith.addf %16, %36 : vector<16x32xf32>
    %38 = vector.extract_strided_slice %6 {offsets = [0, 8], sizes = [16, 8], strides = [1, 1]} : vector<16x32xf32> to vector<16x8xf32>
    %39 = vector.extract_strided_slice %12 {offsets = [0, 8], sizes = [16, 8], strides = [1, 1]} : vector<16x32xf32> to vector<16x8xf32>
    %40 = vector.extract_strided_slice %13 {offsets = [0, 8], sizes = [16, 8], strides = [1, 1]} : vector<16x32xf32> to vector<16x8xf32>
    %cst_23 = arith.constant dense<0.000000e+00> : vector<16x16xf32>
    %41 = tpu.matmul %38, %39, %cst_23 {dimension_numbers = #tpu.dot_dimension_numbers<[1], [1], [0], [0], [0, 0, 1, 0], [], []>} : vector<16x8xf32>, vector<16x8xf32>, vector<16x16xf32> -> vector<16x16xf32>
    %cst_24 = arith.constant 0.353553385 : f32
    %42 = vector.broadcast %cst_24 : f32 to vector<16x16xf32>
    %43 = arith.mulf %41, %42 : vector<16x16xf32>
    %44 = arith.addf %43, %14 : vector<16x16xf32>
    %cst_25 = arith.constant dense<0xFF800000> : vector<16xf32>
    %45 = vector.multi_reduction <maximumf>, %44, %cst_25 [1] : vector<16x16xf32> to vector<16xf32>
    %46 = vector.shape_cast %45 : vector<16xf32> to vector<16x1xf32>
    %47 = vector.broadcast %46 : vector<16x1xf32> to vector<16x16xf32>
    %48 = arith.subf %44, %47 : vector<16x16xf32>
    %49 = math.exp %48 : vector<16x16xf32>
    %cst_26 = arith.constant dense<0.000000e+00> : vector<16xf32>
    %50 = vector.multi_reduction <add>, %49, %cst_26 [1] : vector<16x16xf32> to vector<16xf32>
    %51 = vector.shape_cast %50 : vector<16xf32> to vector<16x1xf32>
    %52 = tpu.reciprocal %51 {approx = true} : vector<16x1xf32> -> vector<16x1xf32>
    %cst_27 = arith.constant dense<0.000000e+00> : vector<16x8xf32>
    %53 = tpu.matmul %49, %40, %cst_27 {dimension_numbers = #tpu.dot_dimension_numbers<[1], [0], [0], [1], [0, 0, 1, 1], [], []>} : vector<16x16xf32>, vector<16x8xf32>, vector<16x8xf32> -> vector<16x8xf32>
    %54 = vector.broadcast %52 : vector<16x1xf32> to vector<16x8xf32>
    %55 = arith.mulf %53, %54 : vector<16x8xf32>
    %56 = vector.extract_strided_slice %15 {offsets = [8, 0], sizes = [8, 32], strides = [1, 1]} : vector<32x32xf32> to vector<8x32xf32>
    %cst_28 = arith.constant dense<0.000000e+00> : vector<16x32xf32>
    %57 = tpu.matmul %55, %56, %cst_28 {dimension_numbers = #tpu.dot_dimension_numbers<[1], [0], [0], [1], [0, 0, 1, 1], [], []>} : vector<16x8xf32>, vector<8x32xf32>, vector<16x32xf32> -> vector<16x32xf32>
    %58 = arith.addf %37, %57 : vector<16x32xf32>
    %59 = vector.extract_strided_slice %6 {offsets = [0, 16], sizes = [16, 8], strides = [1, 1]} : vector<16x32xf32> to vector<16x8xf32>
    %60 = vector.extract_strided_slice %12 {offsets = [0, 16], sizes = [16, 8], strides = [1, 1]} : vector<16x32xf32> to vector<16x8xf32>
    %61 = vector.extract_strided_slice %13 {offsets = [0, 16], sizes = [16, 8], strides = [1, 1]} : vector<16x32xf32> to vector<16x8xf32>
    %cst_29 = arith.constant dense<0.000000e+00> : vector<16x16xf32>
    %62 = tpu.matmul %59, %60, %cst_29 {dimension_numbers = #tpu.dot_dimension_numbers<[1], [1], [0], [0], [0, 0, 1, 0], [], []>} : vector<16x8xf32>, vector<16x8xf32>, vector<16x16xf32> -> vector<16x16xf32>
    %cst_30 = arith.constant 0.353553385 : f32
    %63 = vector.broadcast %cst_30 : f32 to vector<16x16xf32>
    %64 = arith.mulf %62, %63 : vector<16x16xf32>
    %65 = arith.addf %64, %14 : vector<16x16xf32>
    %cst_31 = arith.constant dense<0xFF800000> : vector<16xf32>
    %66 = vector.multi_reduction <maximumf>, %65, %cst_31 [1] : vector<16x16xf32> to vector<16xf32>
    %67 = vector.shape_cast %66 : vector<16xf32> to vector<16x1xf32>
    %68 = vector.broadcast %67 : vector<16x1xf32> to vector<16x16xf32>
    %69 = arith.subf %65, %68 : vector<16x16xf32>
    %70 = math.exp %69 : vector<16x16xf32>
    %cst_32 = arith.constant dense<0.000000e+00> : vector<16xf32>
    %71 = vector.multi_reduction <add>, %70, %cst_32 [1] : vector<16x16xf32> to vector<16xf32>
    %72 = vector.shape_cast %71 : vector<16xf32> to vector<16x1xf32>
    %73 = tpu.reciprocal %72 {approx = true} : vector<16x1xf32> -> vector<16x1xf32>
    %cst_33 = arith.constant dense<0.000000e+00> : vector<16x8xf32>
    %74 = tpu.matmul %70, %61, %cst_33 {dimension_numbers = #tpu.dot_dimension_numbers<[1], [0], [0], [1], [0, 0, 1, 1], [], []>} : vector<16x16xf32>, vector<16x8xf32>, vector<16x8xf32> -> vector<16x8xf32>
    %75 = vector.broadcast %73 : vector<16x1xf32> to vector<16x8xf32>
    %76 = arith.mulf %74, %75 : vector<16x8xf32>
    %77 = vector.extract_strided_slice %15 {offsets = [16, 0], sizes = [8, 32], strides = [1, 1]} : vector<32x32xf32> to vector<8x32xf32>
    %cst_34 = arith.constant dense<0.000000e+00> : vector<16x32xf32>
    %78 = tpu.matmul %76, %77, %cst_34 {dimension_numbers = #tpu.dot_dimension_numbers<[1], [0], [0], [1], [0, 0, 1, 1], [], []>} : vector<16x8xf32>, vector<8x32xf32>, vector<16x32xf32> -> vector<16x32xf32>
    %79 = arith.addf %58, %78 : vector<16x32xf32>
    %80 = vector.extract_strided_slice %6 {offsets = [0, 24], sizes = [16, 8], strides = [1, 1]} : vector<16x32xf32> to vector<16x8xf32>
    %81 = vector.extract_strided_slice %12 {offsets = [0, 24], sizes = [16, 8], strides = [1, 1]} : vector<16x32xf32> to vector<16x8xf32>
    %82 = vector.extract_strided_slice %13 {offsets = [0, 24], sizes = [16, 8], strides = [1, 1]} : vector<16x32xf32> to vector<16x8xf32>
    %cst_35 = arith.constant dense<0.000000e+00> : vector<16x16xf32>
    %83 = tpu.matmul %80, %81, %cst_35 {dimension_numbers = #tpu.dot_dimension_numbers<[1], [1], [0], [0], [0, 0, 1, 0], [], []>} : vector<16x8xf32>, vector<16x8xf32>, vector<16x16xf32> -> vector<16x16xf32>
    %cst_36 = arith.constant 0.353553385 : f32
    %84 = vector.broadcast %cst_36 : f32 to vector<16x16xf32>
    %85 = arith.mulf %83, %84 : vector<16x16xf32>
    %86 = arith.addf %85, %14 : vector<16x16xf32>
    %cst_37 = arith.constant dense<0xFF800000> : vector<16xf32>
    %87 = vector.multi_reduction <maximumf>, %86, %cst_37 [1] : vector<16x16xf32> to vector<16xf32>
    %88 = vector.shape_cast %87 : vector<16xf32> to vector<16x1xf32>
    %89 = vector.broadcast %88 : vector<16x1xf32> to vector<16x16xf32>
    %90 = arith.subf %86, %89 : vector<16x16xf32>
    %91 = math.exp %90 : vector<16x16xf32>
    %cst_38 = arith.constant dense<0.000000e+00> : vector<16xf32>
    %92 = vector.multi_reduction <add>, %91, %cst_38 [1] : vector<16x16xf32> to vector<16xf32>
    %93 = vector.shape_cast %92 : vector<16xf32> to vector<16x1xf32>
    %94 = tpu.reciprocal %93 {approx = true} : vector<16x1xf32> -> vector<16x1xf32>
    %cst_39 = arith.constant dense<0.000000e+00> : vector<16x8xf32>
    %95 = tpu.matmul %91, %82, %cst_39 {dimension_numbers = #tpu.dot_dimension_numbers<[1], [0], [0], [1], [0, 0, 1, 1], [], []>} : vector<16x16xf32>, vector<16x8xf32>, vector<16x8xf32> -> vector<16x8xf32>
    %96 = vector.broadcast %94 : vector<16x1xf32> to vector<16x8xf32>
    %97 = arith.mulf %95, %96 : vector<16x8xf32>
    %98 = vector.extract_strided_slice %15 {offsets = [24, 0], sizes = [8, 32], strides = [1, 1]} : vector<32x32xf32> to vector<8x32xf32>
    %cst_40 = arith.constant dense<0.000000e+00> : vector<16x32xf32>
    %99 = tpu.matmul %97, %98, %cst_40 {dimension_numbers = #tpu.dot_dimension_numbers<[1], [0], [0], [1], [0, 0, 1, 1], [], []>} : vector<16x8xf32>, vector<8x32xf32>, vector<16x32xf32> -> vector<16x32xf32>
    %100 = arith.addf %79, %99 : vector<16x32xf32>
    %c0_41 = arith.constant 0 : index
    %c0_42 = arith.constant 0 : index
    %101 = vector.load %arg10[%c0_41, %c0_42] : memref<1x32xf32, #tpu.memory_space<vmem>>, vector<1x32xf32>
    %102 = vector.broadcast %101 : vector<1x32xf32> to vector<16x32xf32>
    %103 = arith.addf %100, %102 : vector<16x32xf32>
    %104 = arith.addf %0, %103 : vector<16x32xf32>
    %cst_43 = arith.constant dense<0.000000e+00> : vector<16xf32>
    %105 = vector.multi_reduction <add>, %104, %cst_43 [1] : vector<16x32xf32> to vector<16xf32>
    %106 = vector.shape_cast %105 : vector<16xf32> to vector<16x1xf32>
    %cst_44 = arith.constant 3.200000e+01 : f32
    %107 = vector.broadcast %cst_44 : f32 to vector<16x1xf32>
    %108 = arith.divf %106, %107 : vector<16x1xf32>
    %109 = vector.broadcast %108 : vector<16x1xf32> to vector<16x32xf32>
    %110 = arith.subf %104, %109 : vector<16x32xf32>
    %111 = arith.mulf %110, %110 : vector<16x32xf32>
    %cst_45 = arith.constant dense<0.000000e+00> : vector<16xf32>
    %112 = vector.multi_reduction <add>, %111, %cst_45 [1] : vector<16x32xf32> to vector<16xf32>
    %113 = vector.shape_cast %112 : vector<16xf32> to vector<16x1xf32>
    %cst_46 = arith.constant 3.200000e+01 : f32
    %114 = vector.broadcast %cst_46 : f32 to vector<16x1xf32>
    %115 = arith.divf %113, %114 : vector<16x1xf32>
    %116 = vector.broadcast %108 : vector<16x1xf32> to vector<16x32xf32>
    %117 = arith.subf %104, %116 : vector<16x32xf32>
    %cst_47 = arith.constant 9.99999974E-6 : f32
    %118 = vector.broadcast %cst_47 : f32 to vector<16x1xf32>
    %119 = arith.addf %115, %118 : vector<16x1xf32>
    %120 = math.rsqrt %119 : vector<16x1xf32>
    %121 = vector.broadcast %120 : vector<16x1xf32> to vector<16x32xf32>
    %122 = arith.mulf %117, %121 : vector<16x32xf32>
    %c0_48 = arith.constant 0 : index
    %c0_49 = arith.constant 0 : index
    %123 = vector.load %arg11[%c0_48, %c0_49] : memref<1x32xf32, #tpu.memory_space<vmem>>, vector<1x32xf32>
    %124 = vector.broadcast %123 : vector<1x32xf32> to vector<16x32xf32>
    %125 = arith.mulf %122, %124 : vector<16x32xf32>
    %c0_50 = arith.constant 0 : index
    %c0_51 = arith.constant 0 : index
    %126 = vector.load %arg12[%c0_50, %c0_51] : memref<1x32xf32, #tpu.memory_space<vmem>>, vector<1x32xf32>
    %127 = vector.broadcast %126 : vector<1x32xf32> to vector<16x32xf32>
    %128 = arith.addf %125, %127 : vector<16x32xf32>
    %c0_52 = arith.constant 0 : index
    %c0_53 = arith.constant 0 : index
    %129 = vector.load %arg3[%c0_52, %c0_53] : memref<16x32xf32, #tpu.memory_space<vmem>>, vector<16x32xf32>
    %130 = arith.mulf %128, %129 : vector<16x32xf32>
    %c0_54 = arith.constant 0 : index
    %c0_55 = arith.constant 0 : index
    %131 = vector.load %arg13[%c0_54, %c0_55] : memref<16x32xf32, #tpu.memory_space<vmem>>, vector<16x32xf32>
    tpu.vector_store %arg13[%c0_54, %c0_55], %130 {strides = array<i32>} : memref<16x32xf32, #tpu.memory_space<vmem>>, vector<16x32xf32>,
    return
  }
  func.func @transform_0(%arg0: i32) -> (i32, i32) {
    %c0_i32 = arith.constant 0 : i32
    %c0_i32_0 = arith.constant 0 : i32
    return %arg0, %c0_i32 : i32, i32
  }
  func.func @transform_1(%arg0: i32) -> (i32, i32) {
    %c0_i32 = arith.constant 0 : i32
    %c0_i32_0 = arith.constant 0 : i32
    return %arg0, %c0_i32 : i32, i32
  }
  func.func @transform_2(%arg0: i32) -> (i32, i32) {
    %c0_i32 = arith.constant 0 : i32
    %c0_i32_0 = arith.constant 0 : i32
    return %arg0, %c0_i32 : i32, i32
  }
  func.func @transform_3(%arg0: i32) -> (i32, i32) {
    %c0_i32 = arith.constant 0 : i32
    %c0_i32_0 = arith.constant 0 : i32
    %c0_i32_1 = arith.constant 0 : i32
    return %c0_i32, %c0_i32_0 : i32, i32
  }
  func.func @transform_4(%arg0: i32) -> (i32, i32) {
    %c0_i32 = arith.constant 0 : i32
    %c0_i32_0 = arith.constant 0 : i32
    %c0_i32_1 = arith.constant 0 : i32
    return %c0_i32, %c0_i32_0 : i32, i32
  }
  func.func @transform_5(%arg0: i32) -> (i32, i32) {
    %c0_i32 = arith.constant 0 : i32
    %c0_i32_0 = arith.constant 0 : i32
    %c0_i32_1 = arith.constant 0 : i32
    return %c0_i32, %c0_i32_0 : i32, i32
  }
  func.func @transform_6(%arg0: i32) -> (i32, i32) {
    %c0_i32 = arith.constant 0 : i32
    %c0_i32_0 = arith.constant 0 : i32
    %c0_i32_1 = arith.constant 0 : i32
    return %c0_i32, %c0_i32_0 : i32, i32
  }
  func.func @transform_7(%arg0: i32) -> (i32, i32) {
    %c0_i32 = arith.constant 0 : i32
    %c0_i32_0 = arith.constant 0 : i32
    %c0_i32_1 = arith.constant 0 : i32
    return %c0_i32, %c0_i32_0 : i32, i32
  }
  func.func @transform_8(%arg0: i32) -> (i32, i32) {
    %c0_i32 = arith.constant 0 : i32
    %c0_i32_0 = arith.constant 0 : i32
    %c0_i32_1 = arith.constant 0 : i32
    return %c0_i32, %c0_i32_0 : i32, i32
  }
  func.func @transform_9(%arg0: i32) -> (i32, i32) {
    %c0_i32 = arith.constant 0 : i32
    %c0_i32_0 = arith.constant 0 : i32
    %c0_i32_1 = arith.constant 0 : i32
    return %c0_i32, %c0_i32_0 : i32, i32
  }
  func.func @transform_10(%arg0: i32) -> (i32, i32) {
    %c0_i32 = arith.constant 0 : i32
    %c0_i32_0 = arith.constant 0 : i32
    %c0_i32_1 = arith.constant 0 : i32
    return %c0_i32, %c0_i32_0 : i32, i32
  }
  func.func @transform_11(%arg0: i32) -> (i32, i32) {
    %c0_i32 = arith.constant 0 : i32
    %c0_i32_0 = arith.constant 0 : i32
    %c0_i32_1 = arith.constant 0 : i32
    return %c0_i32, %c0_i32_0 : i32, i32
  }
  func.func @transform_12(%arg0: i32) -> (i32, i32) {
    %c0_i32 = arith.constant 0 : i32
    %c0_i32_0 = arith.constant 0 : i32
    return %arg0, %c0_i32 : i32, i32
  }
}

</mosaic_0001>

<bundles_post_ra>
// kernel: tpu_custom_call.1
= control target key start
LH: loop header
LB: loop body
LE: loop exit
PB: predicated region body
PF: predicated region fallthrough
CT: control target
= control target key end

     0   :  { %17 = vsyncpa [#allocation3], 0  ;;  %s2451_s0 = inlined_call_operand.hbm [shape: f32[16,32], index: 0, kind: input, shape index: {}]   ;;  %s2452_s1 = inlined_call_operand.hbm [shape: f32[16,32], index: 1, kind: input, shape index: {}]   ;;  %s2453_s2 = inlined_call_operand.hbm [shape: f32[16,32], index: 2, kind: input, shape index: {}]   ;;  %s2454_s3 = inlined_call_operand.hbm [shape: f32[16,16], index: 3, kind: input, shape index: {}]   ;;  %s2455_s4 = inlined_call_operand.hbm [shape: f32[32,32], index: 4, kind: input, shape index: {}]   ;;  %s2456_s5 = inlined_call_operand.hbm [shape: f32[32,64], index: 5, kind: input, shape index: {}]   ;;  %s2457_s6 = inlined_call_operand.hbm [shape: f32[32,32], index: 6, kind: input, shape index: {}]   ;;  %s2458_s7 = inlined_call_operand.vmem [shape: f32[1,32], index: 7, kind: input, shape index: {}]   ;;  %s2459_s8 = inlined_call_operand.vmem [shape: f32[1,64], index: 8, kind: input, shape index: {}]   ;;  %s2460_s9 = inlined_call_operand.vmem [shape: f32[1,32], index: 9, kind: input, shape index: {}]   ;;  %s2461_s10 = inlined_call_operand.vmem [shape: f32[1,32], index: 10, kind: input, shape index: {}]   ;;  %s2462_s11 = inlined_call_operand.vmem [shape: f32[1,32], index: 11, kind: input, shape index: {}]   ;;  %s2463_s12 = inlined_call_operand.hbm [shape: f32[16,32], index: 12, kind: output, shape index: {}]  }
   0x1   :  { %18 = vsyncpa [#allocation6], 0 }
   0x2   :  { %19 = vsyncpa [#allocation9], 0 }
   0x3   :  { %20 = vsyncpa [#allocation12], 0 }
   0x4   :  { %21 = vsyncpa [#allocation4], 0  ;;  %s2087_s21 = smov [#allocation5]   ;;  %s2088_s23 = smov [#allocation8]  }
   0x5   :  { %s39_s22 = sshll.u32 %s2087_s21, 4  ;;  %s63_s24 = sshll.u32 %s2088_s23, 4  ;;  %s40_s22 = int_to_ptr.vmem [resolvable:$true] %s39_s22  ;;  %s2169_s24 = int_to_ptr.vmem [resolvable:$true] %s63_s24 }
   0x6   :  { %s1901_s27 = scalar_lea.hbm %s2452_s1, 256 }
   0x7   :  { %p1902_p0 = scmp.ne.s32.totalorder %s2452_s1, %s1901_s27  ;;  %p1905_p1 = scmp.lt.u32.totalorder %s1901_s27, %s2452_s1 }
   0x9   :  { %p1907_p2 = pnand %p1905_p1, %p1902_p0 }
   0xb   :  { %1910 = shalt.err (!%p1907_p2)
}
   0xc   :  { %s1911_s14 = scalar_lea.vmem %s40_s22, 256  ;;  %p1916_p4 = scmp.lt.s32.totalorder %s40_s22, %s40_s22 }
   0xd   :  { %p1912_p3 = scmp.ne.s32.totalorder %s40_s22, %s1911_s14  ;;  %p1917_p5 = scmp.lt.s32.totalorder %s1911_s14, %s1911_s14 }
   0xf   :  { %p1918_p6 = por %p1917_p5, %p1916_p4 }
  0x11   :  { %p1919_p7 = pnand %p1918_p6, %p1912_p3 }
  0x13   :  { %1922 = shalt.err (!%p1919_p7)
}
  0x14   :  { %s2089_s15 = smov 128   ;;  %s2090_s16 = smov 8  }
  0x15   :  { %45 = dma.hbm_to_vmem [thread:$0]  %s2452_s1, 256, %s40_s22, [#allocation6], %s2089_s15, %s2089_s15, %s2090_s16  }
  0x16   :  { %s1923_s21 = scalar_lea.hbm %s2454_s3, 256 }
  0x17   :  { %p1924_p8 = scmp.ne.s32.totalorder %s2454_s3, %s1923_s21  ;;  %p1927_p9 = scmp.lt.u32.totalorder %s1923_s21, %s2454_s3 }
  0x19   :  { %p1929_p10 = pnand %p1927_p9, %p1924_p8 }
  0x1b   :  { %1932 = shalt.err (!%p1929_p10)
}
  0x1c   :  { %s1933_s28 = scalar_lea.vmem %s2169_s24, 256  ;;  %p1938_p12 = scmp.lt.s32.totalorder %s2169_s24, %s2169_s24 }
  0x1d   :  { %p1934_p11 = scmp.ne.s32.totalorder %s2169_s24, %s1933_s28  ;;  %p1939_p13 = scmp.lt.s32.totalorder %s1933_s28, %s1933_s28 }
  0x1f   :  { %p1940_p0 = por %p1939_p13, %p1938_p12 }
  0x21   :  { %p1941_p1 = pnand %p1940_p0, %p1934_p11 }
  0x23   :  { %1944 = shalt.err (!%p1941_p1)
}
  0x24   :  { %69 = dma.hbm_to_vmem [thread:$0]  %s2454_s3, 256, %s2169_s24, [#allocation9], %s2089_s15, %s2089_s15, %s2090_s16  }
  0x25   :  { %s2091_s29 = smov [#allocation11]   ;;  %s2092_s13 = smov [#allocation2]  }
  0x26   :  { %s87_s30 = sshll.u32 %s2091_s29, 4  ;;  %s27_s14 = sshll.u32 %s2092_s13, 4  ;;  %s88_s30 = int_to_ptr.vmem [resolvable:$true] %s87_s30  ;;  %s2206_s14 = int_to_ptr.vmem [resolvable:$true] %s27_s14 }
  0x27   :  { %s1945_s19 = scalar_lea.hbm %s2456_s5, 512 }
  0x28   :  { %p1946_p2 = scmp.ne.s32.totalorder %s2456_s5, %s1945_s19  ;;  %p1949_p3 = scmp.lt.u32.totalorder %s1945_s19, %s2456_s5 }
  0x2a   :  { %p1951_p4 = pnand %p1949_p3, %p1946_p2 }
  0x2c   :  { %1954 = shalt.err (!%p1951_p4)
}
  0x2d   :  { %s1955_s3 = scalar_lea.vmem %s88_s30, 512  ;;  %p1960_p6 = scmp.lt.s32.totalorder %s88_s30, %s88_s30 }
  0x2e   :  { %p1956_p5 = scmp.ne.s32.totalorder %s88_s30, %s1955_s3  ;;  %p1961_p7 = scmp.lt.s32.totalorder %s1955_s3, %s1955_s3 }
  0x30   :  { %p1962_p8 = por %p1961_p7, %p1960_p6 }
  0x32   :  { %p1963_p9 = pnand %p1962_p8, %p1956_p5 }
  0x34   :  { %1966 = shalt.err (!%p1963_p9)
}
  0x35   :  { %93 = dma.hbm_to_vmem [thread:$0]  %s2456_s5, 512, %s88_s30, [#allocation12], %s2089_s15, %s2089_s15, %s2090_s16  }
  0x36   :  { %s1967_s1 = scalar_lea.hbm %s2451_s0, 256 }
  0x37   :  { %p1968_p10 = scmp.ne.s32.totalorder %s2451_s0, %s1967_s1  ;;  %p1971_p11 = scmp.lt.u32.totalorder %s1967_s1, %s2451_s0 }
  0x39   :  { %p1973_p12 = pnand %p1971_p11, %p1968_p10 }
  0x3b   :  { %1976 = shalt.err (!%p1973_p12)
}
  0x3c   :  { %s1977_s18 = scalar_lea.vmem %s2206_s14, 256  ;;  %p1982_p0 = scmp.lt.s32.totalorder %s2206_s14, %s2206_s14 }
  0x3d   :  { %p1978_p13 = scmp.ne.s32.totalorder %s2206_s14, %s1977_s18  ;;  %p1983_p1 = scmp.lt.s32.totalorder %s1977_s18, %s1977_s18 }
  0x3f   :  { %p1984_p2 = por %p1983_p1, %p1982_p0 }
  0x41   :  { %p1985_p3 = pnand %p1984_p2, %p1978_p13 }
  0x43   :  { %1988 = shalt.err (!%p1985_p3)
}
  0x44   :  { %33 = dma.hbm_to_vmem [thread:$0]  %s2451_s0, 256, %s2206_s14, [#allocation3], %s2089_s15, %s2089_s15, %s2090_s16  }
  0x45   :  { %s2093_s19 = smov [#allocation7]   ;;  %s2094_s21 = smov [#allocation10]  }
  0x46   :  { %s51_s20 = sshll.u32 %s2093_s19, 4  ;;  %s75_s23 = sshll.u32 %s2094_s21, 4  ;;  %s52_s20 = int_to_ptr.vmem [resolvable:$true] %s51_s20  ;;  %s2243_s23 = int_to_ptr.vmem [resolvable:$true] %s75_s23 }
  0x47   :  { %s1989_s24 = scalar_lea.hbm %s2453_s2, 256 }
  0x48   :  { %p1990_p4 = scmp.ne.s32.totalorder %s2453_s2, %s1989_s24  ;;  %p1993_p5 = scmp.lt.u32.totalorder %s1989_s24, %s2453_s2 }
  0x4a   :  { %p1995_p6 = pnand %p1993_p5, %p1990_p4 }
  0x4c   :  { %1998 = shalt.err (!%p1995_p6)
}
  0x4d   :  { %s1999_s0 = scalar_lea.vmem %s52_s20, 256  ;;  %p2004_p8 = scmp.lt.s32.totalorder %s52_s20, %s52_s20 }
  0x4e   :  { %p2000_p7 = scmp.ne.s32.totalorder %s52_s20, %s1999_s0  ;;  %p2005_p9 = scmp.lt.s32.totalorder %s1999_s0, %s1999_s0 }
  0x50   :  { %p2006_p10 = por %p2005_p9, %p2004_p8 }
  0x52   :  { %p2007_p11 = pnand %p2006_p10, %p2000_p7 }
  0x54   :  { %2010 = shalt.err (!%p2007_p11)
}
  0x55   :  { %57 = dma.hbm_to_vmem [thread:$0]  %s2453_s2, 256, %s52_s20, [#allocation6], %s2089_s15, %s2089_s15, %s2090_s16  }
  0x56   :  { %s2011_s17 = scalar_lea.hbm %s2455_s4, 512 }
  0x57   :  { %p2012_p12 = scmp.ne.s32.totalorder %s2455_s4, %s2011_s17  ;;  %p2015_p13 = scmp.lt.u32.totalorder %s2011_s17, %s2455_s4 }
  0x59   :  { %p2017_p0 = pnand %p2015_p13, %p2012_p12 }
  0x5b   :  { %2020 = shalt.err (!%p2017_p0)
}
  0x5c   :  { %s2021_s21 = scalar_lea.vmem %s2243_s23, 512  ;;  %p2026_p2 = scmp.lt.s32.totalorder %s2243_s23, %s2243_s23 }
  0x5d   :  { %p2022_p1 = scmp.ne.s32.totalorder %s2243_s23, %s2021_s21  ;;  %p2027_p3 = scmp.lt.s32.totalorder %s2021_s21, %s2021_s21 }
  0x5f   :  { %p2028_p4 = por %p2027_p3, %p2026_p2 }
  0x61   :  { %p2029_p5 = pnand %p2028_p4, %p2022_p1 }
  0x63   :  { %2032 = shalt.err (!%p2029_p5)
}
  0x64   :  { %81 = dma.hbm_to_vmem [thread:$0]  %s2455_s4, 512, %s2243_s23, [#allocation9], %s2089_s15, %s2089_s15, %s2090_s16  }
  0x65   :  { %s2095_s25 = smov [#allocation13]   ;;  %s2033_s27 = scalar_lea.hbm %s2457_s6, 512 }
  0x66   :  { %s99_s3 = sshll.u32 %s2095_s25, 4  ;;  %p2034_p6 = scmp.ne.s32.totalorder %s2457_s6, %s2033_s27  ;;  %s100_s3 = int_to_ptr.vmem [resolvable:$true] %s99_s3 }
  0x67   :  { %p2037_p7 = scmp.lt.u32.totalorder %s2033_s27, %s2457_s6 }
  0x69   :  { %p2039_p8 = pnand %p2037_p7, %p2034_p6 }
  0x6b   :  { %2042 = shalt.err (!%p2039_p8)
}
  0x6c   :  { %s2043_s22 = scalar_lea.vmem %s100_s3, 512  ;;  %p2048_p10 = scmp.lt.s32.totalorder %s100_s3, %s100_s3 }
  0x6d   :  { %p2044_p9 = scmp.ne.s32.totalorder %s100_s3, %s2043_s22  ;;  %p2049_p11 = scmp.lt.s32.totalorder %s2043_s22, %s2043_s22 }
  0x6f   :  { %p2050_p12 = por %p2049_p11, %p2048_p10 }
  0x71   :  { %p2051_p13 = pnand %p2050_p12, %p2044_p9 }
  0x73   :  { %2054 = shalt.err (!%p2051_p13)
}
  0x74   :  { %105 = dma.hbm_to_vmem [thread:$0]  %s2457_s6, 512, %s100_s3, [#allocation12], %s2089_s15, %s2089_s15, %s2090_s16  }
  0x75   :  { %2077 = dma.done.wait [#allocation3], 256  }
  0x76   :  { %2078 = vsyncadd [#allocation3], 4294967040 }
  0x77   :  { %2079 = dma.done.wait [#allocation6], 512  }
  0x78   :  { %2080 = vsyncadd [#allocation6], 4294966784 }
  0x79   :  { %2081 = dma.done.wait [#allocation9], 768  }
  0x7a   :  { %2082 = vsyncadd [#allocation9], 4294966528 }
  0x7b   :  { %2083 = dma.done.wait [#allocation12], 1024  }
  0x7c   :  { %2084 = vsyncadd [#allocation12], 4294966272  ;;  %vm152_vm0 = vcmask 261120   ;;  %v234_v0 = vld [vmem:[#allocation11] sm:$0xff]  ;;  %v235_v1 = vld [vmem:[#allocation11 + $0x8] sm:$0xff]  ;;  %vm332_vm1 = vcmask 64512  }
  0x7d   :  { %v236_v2 = vld [vmem:[#allocation11 + $0x10] sm:$0xff]  ;;  %v1759_v3 = vpack.c.bf16 %v235_v1, %v234_v0  ;;  %v237_v4 = vld [vmem:[#allocation11 + $0x18] sm:$0xff]  ;;  %v141_v6 = vld [vmem:[#allocation10] sm:$0xff]  ;;  %s2098_s18 = smov 88   ;;  %vm424_vm3 = vcmask 130048   ;;  %s2099_s5 = smov 112  }
  0x7e   :  { %v139_v5 = vld [vmem:[#allocation5] sm:$0xff]  ;;  %v1763_v7 = vpack.c.bf16 %v237_v4, %v236_v2  ;;  %v142_v8 = vld [vmem:[#allocation10 + $0x8] sm:$0xff]  ;;  %v144_v11 = vld [vmem:[#allocation10 + $0x18] sm:$0xff]  ;;  %s2100_s30 = smov 104   ;;  %s2101_s19 = smov 80  }
  0x7f   :  { %1672 = vmatprep.mubr.msk.f32.mxu1 %vm152_vm0, %v139_v5  ;;  %v143_v9 = vld [vmem:[#allocation10 + $0x10] sm:$0xff]  ;;  %1760 = vmatprep.subr.bf16.mxu1 %v1759_v3  ;;  %v1751_v10 = vpack.c.bf16 %v142_v8, %v141_v6  ;;  %v2296_v12 = vld [vmem:[#allocation2] sm:$0xff]  ;;  %v140_v14 = vld [vmem:[#allocation5 + $0x8] sm:$0xff]  ;;  %s2102_s21 = smov 72   ;;  %s2103_s26 = smov [#allocation14]  }
  0x80   :  { %1762 = vmatpush3.bf16.msra.mxu1 %v1759_v3  ;;  %v1755_v13 = vpack.c.bf16 %v144_v11, %v143_v9  ;;  %1661 = vmatprep.mubr.msk.f32.mxu0 %vm152_vm0, %v2296_v12  ;;  %v2300_v15 = vld [vmem:[#allocation2 + $0x8] sm:$0xff]  ;;  %v1559_v16 = vld [vmem:[%s2459_s8] ss:$0 sm:$0xff]  ;;  %vm2313_vm2 = vmpackc.low %vm332_vm1, %vm332_vm1  ;;  %s2096_s8 = smov 96   ;;  %s1541_s27 = sshll.u32 %s2103_s26, 4  ;;  %s1542_s27 = int_to_ptr.vmem [resolvable:$true] %s1541_s27 }
  0x81   :  { %1764 = vmatprep.subr.bf16.mxu1 %v1763_v7  ;;  %1752 = vmatprep.subr.bf16.mxu0 %v1751_v10  ;;  %v1556_v20 = vld [vmem:[%s2458_s7] ss:$0 sm:$0xff]  ;;  %s2097_s7 = smov 120   ;;  %v2339_v39 = vld [vmem:[#allocation8] sm:$0xff]  ;;  %v2341_v42 = vld [vmem:[#allocation8 + $0x8] sm:$0xff]  ;;  %p2060_p1 = scmp.lt.s32.totalorder %s1542_s27, %s1542_s27 }
  0x82   :  { %1754 = vmatpush3.bf16.msra.mxu0 %v1751_v10 }
  0x83   :  { %1756 = vmatprep.subr.bf16.mxu0 %v1755_v13 }
  0x84   :  { %1766 = vmatpush3.bf16.msra.mxu1 %v1763_v7 }
  0x86   :  { %1758 = vmatpush3.bf16.msra.mxu0 %v1755_v13 }
  0x87   :  { %1673 = vmatmul.mubr.msk.f32.vlgmr.msra.gmra.mrb[0].mxu1 %vm152_vm0, %v140_v14 }
  0x89   :  { %1662 = vmatmul.mubr.msk.f32.vlgmr.msra.gmra.mrb[0].mxu0 %vm152_vm0, %v2300_v15 }
 0x15a   :  { %v1674_v17 = vpop.f32.mrb[0].mxu1 }
 0x15b   :  { %v323_v18 = vadd.f32 %v1674_v17, %v1559_v16  ;;  %v317_v19 = vpop.f32.mrb[1].mxu1 }
 0x15c   :  { %v318_v21 = vadd.f32 %v1559_v16, %v317_v19  ;;  %v1663_v22 = vpop.f32.mrb[0].mxu0 }
 0x15d   :  { %v225_v24 = vpop.f32.mrb[1].mxu0  ;;  %v2330_v28 = vadd.f32 %v1663_v22, %v1556_v20 }
 0x15e   :  { %v2317_v25 = vpack.i.bf16 %v323_v18, %v318_v21  ;;  %v1767_v26 = vpack.c.bf16 %v323_v18, %v318_v21  ;;  %v2319_v27 = vadd.f32 %v1556_v20, %v225_v24 }
 0x160   :  { %1831 = vrot.lane.b32.xlu1 %v2317_v25, %s2096_s8  ;;  %1769 = vmatprep.subr.msk.bf16.mxu0 %vm2313_vm2, %v1767_v26 }
 0x161   :  { %1772 = vmatpush3.bf16.xpose.msk.msra.mxu0 %vm2313_vm2, %v1767_v26  ;;  %1679 = vmatprep.mubr.msk.f32.mxu0 %vm332_vm1, %v2319_v27 }
 0x164   :  { %1836 = vrot.lane.b32.xlu1 %v2317_v25, %s2097_s7 }
 0x168   :  { %536 = vrot.lane.b32.xlu1 %v2330_v28, %s2097_s7  ;;  %1680 = vmatmul.mubr.msk.f32.vlgmr.msra.gmra.mrb[2].mxu0 %vm332_vm1, %v2330_v28 }
 0x16c   :  { %1841 = vrot.lane.b32.xlu1 %v2317_v25, %s2098_s18 }
 0x1d2   :  { %v1832_v29 = vpop.permute.xlu1 %1831 }
 0x1d3   :  { %v1834_v30 = vunpack.i.h.bf16 %v1832_v29  ;;  %v1833_v31 = vunpack.i.l.bf16 %v1832_v29 }
 0x1d5   :  { %v1773_v32 = vpack.c.bf16 %v1834_v30, %v1833_v31 }
 0x1d6   :  { %v1837_v33 = vpop.permute.xlu1 %1836 }
 0x1d7   :  { %v1839_v34 = vunpack.i.h.bf16 %v1837_v33  ;;  %v1838_v35 = vunpack.i.l.bf16 %v1837_v33  ;;  %1774 = vmatprep.subr.bf16.mxu1 %v1773_v32 }
 0x1d8   :  { %1776 = vmatpush3.bf16.msra.mxu1 %v1773_v32 }
 0x1d9   :  { %v1777_v36 = vpack.c.bf16 %v1839_v34, %v1838_v35  ;;  %v329_v35 = vld [vmem:[#allocation13 + $0x8] sm:$0xff] }
 0x1da   :  { %v537_v52 = vpop.permute.xlu1 %536  ;;  %1703 = vmatprep.subr.mxu0 %v329_v35 }
 0x1db   :  { %1779 = vmatprep.subr.msk.bf16.mxu1 %vm2313_vm2, %v1777_v36  ;;  %1704 = vmatpush3.msra.mxu0 %v329_v35 }
 0x1de   :  { %v1842_v54 = vpop.permute.xlu1 %1841 }
 0x1df   :  { %v1844_v56 = vunpack.i.h.bf16 %v1842_v54  ;;  %v1843_v57 = vunpack.i.l.bf16 %v1842_v54 }
 0x1e1   :  { %v1783_v59 = vpack.c.bf16 %v1844_v56, %v1843_v57 }
 0x23b   :  { %v1681_v37 = vpop.f32.mrb[2].mxu0 }
 0x23c   :  { %v411_v38 = vpop.f32.mrb[3].mxu0  ;;  %v421_v40 = vmul.f32 0.35355338, %v1681_v37 }
 0x23d   :  { %v420_v41 = vmul.f32 0.35355338, %v411_v38 }
 0x23e   :  { %v423_v45 = vadd.f32 %v421_v40, %v2341_v42 }
 0x23f   :  { %v422_v43 = vadd.f32 %v420_v41, %v2339_v39 }
 0x240   :  { %v428_v46 = vsel %vm424_vm3, %v423_v45, -inf }
 0x241   :  { %v425_v44 = vsel %vm424_vm3, %v422_v43, -inf }
 0x242   :  { %426 = vmax.xlane.f32.xlu0 %v425_v44 }
 0x246   :  { %429 = vmax.xlane.f32.xlu0 %v428_v46 }
 0x25c   :  { %534 = vrot.lane.b32.xlu0 %v2319_v27, %s2097_s7 }
 0x2cf   :  { %v427_v47 = vpop.xlane.xlu0 %426 }
 0x2d0   :  { %v431_v48 = vsub.f32 %v422_v43, %v427_v47 }
 0x2d2   :  { %v433_v49 = vmul.f32 1.442695, %v431_v48 }
 0x2d3   :  { %v430_v50 = vpop.xlane.xlu0 %429 }
 0x2d4   :  { %1865 = vpow2.f32 %v433_v49  ;;  %v432_v51 = vsub.f32 %v423_v45, %v430_v50 }
 0x2d6   :  { %v435_v53 = vmul.f32 1.442695, %v432_v51 }
 0x2d7   :  { %v535_v60 = vpop.permute.xlu0 %534 }
 0x2d8   :  { %1867 = vpow2.f32 %v435_v53 }
 0x2de   :  { %v2349_v55 = vpop.eup %1865 }
 0x2df   :  { %1686 = vmatprep.mubr.msk.f32.mxu1 %vm424_vm3, %v2349_v55  ;;  %v437_v31 = vsel %vm424_vm3, %v2349_v55, 0.0 }
 0x2e2   :  { %v1868_v58 = vpop.eup %1867 }
 0x2e3   :  { %1687 = vmatmul.mubr.msk.f32.vlgmr.msra.gmra.mrb[2].mxu1 %vm424_vm3, %v1868_v58  ;;  %v440_v32 = vsel %vm424_vm3, %v1868_v58, 0.0 }
 0x2e4   :  { %1782 = vmatpush3.bf16.xpose.msk.msra.mxu1 %vm2313_vm2, %v1777_v36  ;;  %1693 = vmatprep.mubr.msk.f32.mxu1 %vm332_vm1, %v535_v60  ;;  %v328_v36 = vld [vmem:[#allocation13] sm:$0xff] }
 0x2e5   :  { %1784 = vmatprep.subr.bf16.mxu1 %v1783_v59  ;;  %1708 = vmatprep.subr.mxu0 %v328_v36 }
 0x2eb   :  { %1694 = vmatmul.mubr.msk.f32.vlgmr.msra.gmra.mrb[4].mxu1 %vm332_vm1, %v537_v52 }
 0x2ec   :  { %1786 = vmatpush3.bf16.msra.mxu1 %v1783_v59 }
 0x3b6   :  { %v2358_v61 = vpop.f32.mrb[2].mxu1 }
 0x3b7   :  { %v2360_v62 = vpop.f32.mrb[3].mxu1 }
 0x3be   :  { %v1695_v63 = vpop.f32.mrb[4].mxu1 }
 0x3bf   :  { %v626_v0 = vmul.f32 0.35355338, %v1695_v63  ;;  %v616_v1 = vpop.f32.mrb[5].mxu1 }
 0x3c0   :  { %v625_v2 = vmul.f32 0.35355338, %v616_v1 }
 0x3c1   :  { %v628_v3 = vadd.f32 %v626_v0, %v2341_v42 }
 0x3c2   :  { %v627_v4 = vadd.f32 %v625_v2, %v2339_v39 }
 0x3c3   :  { %v632_v5 = vsel %vm424_vm3, %v628_v3, -inf }
 0x3c4   :  { %633 = vmax.xlane.f32.xlu0 %v632_v5  ;;  %v629_v6 = vsel %vm424_vm3, %v627_v4, -inf }
 0x3c5   :  { %630 = vmax.xlane.f32.xlu1 %v629_v6 }
 0x3d6   :  { %900 = vrot.lane.b32.xlu1 %v2319_v27, %s2099_s5 }
 0x3da   :  { %1846 = vrot.lane.b32.xlu0 %v2317_v25, %s2099_s5  ;;  %902 = vrot.lane.b32.xlu1 %v2330_v28, %s2099_s5 }
 0x3de   :  { %1851 = vrot.lane.b32.xlu1 %v2317_v25, %s2100_s30 }
 0x3e2   :  { %1187 = vrot.lane.b32.xlu1 %v2319_v27, %s2100_s30 }
 0x3e6   :  { %1189 = vrot.lane.b32.xlu1 %v2330_v28, %s2100_s30 }
 0x451   :  { %v634_v7 = vpop.xlane.xlu0 %633 }
 0x452   :  { %v636_v8 = vsub.f32 %v628_v3, %v634_v7  ;;  %v631_v9 = vpop.xlane.xlu1 %630 }
 0x453   :  { %v635_v10 = vsub.f32 %v627_v4, %v631_v9 }
 0x454   :  { %v639_v11 = vmul.f32 1.442695, %v636_v8 }
 0x455   :  { %v637_v13 = vmul.f32 1.442695, %v635_v10  ;;  %v1847_v14 = vpop.permute.xlu0 %1846 }
 0x456   :  { %1869 = vpow2.f32 %v639_v11  ;;  %v1849_v16 = vunpack.i.h.bf16 %v1847_v14  ;;  %v1848_v17 = vunpack.i.l.bf16 %v1847_v14  ;;  %v901_v18 = vpop.permute.xlu1 %900 }
 0x457   :  { %1871 = vpow2.f32 %v637_v13 }
 0x458   :  { %v1787_v19 = vpack.c.bf16 %v1849_v16, %v1848_v17 }
 0x45a   :  { %1789 = vmatprep.subr.msk.bf16.mxu1 %vm2313_vm2, %v1787_v19  ;;  %v903_v20 = vpop.permute.xlu1 %902 }
 0x45e   :  { %v1852_v21 = vpop.permute.xlu1 %1851 }
 0x45f   :  { %v1854_v22 = vunpack.i.h.bf16 %v1852_v21  ;;  %v1853_v24 = vunpack.i.l.bf16 %v1852_v21 }
 0x460   :  { %v1870_v26 = vpop.eup %1869 }
 0x461   :  { %v1872_v27 = vpop.eup %1871  ;;  %v1797_v28 = vpack.c.bf16 %v1854_v22, %v1853_v24  ;;  %v644_v29 = vsel %vm424_vm3, %v1870_v26, 0.0 }
 0x462   :  { %645 = vadd.xlane.f32.xlu1 %v644_v29  ;;  %1700 = vmatprep.mubr.msk.f32.mxu1 %vm424_vm3, %v1872_v27  ;;  %v641_v30 = vsel %vm424_vm3, %v1872_v27, 0.0  ;;  %v1188_v33 = vpop.permute.xlu1 %1187 }
 0x463   :  { %1701 = vmatmul.mubr.msk.f32.vlgmr.msra.gmra.mrb[6].mxu1 %vm424_vm3, %v1870_v26  ;;  %642 = vadd.xlane.f32.xlu0 %v641_v30  ;;  %v330_v26 = vld [vmem:[#allocation13 + $0x10] sm:$0xff] }
 0x464   :  { %1792 = vmatpush3.bf16.xpose.msk.msra.mxu1 %vm2313_vm2, %v1787_v19  ;;  %1717 = vmatprep.mubr.msk.f32.mxu1 %vm332_vm1, %v901_v18 }
 0x465   :  { %1799 = vmatprep.subr.msk.bf16.mxu1 %vm2313_vm2, %v1797_v28 }
 0x466   :  { %v1190_v34 = vpop.permute.xlu1 %1189 }
 0x467   :  { %438 = vadd.xlane.f32.xlu0 %v437_v31 }
 0x46b   :  { %1718 = vmatmul.mubr.msk.f32.vlgmr.msra.gmra.mrb[8].mxu1 %vm332_vm1, %v903_v20  ;;  %441 = vadd.xlane.f32.xlu0 %v440_v32 }
 0x46c   :  { %1802 = vmatpush3.bf16.xpose.msk.msra.mxu1 %vm2313_vm2, %v1797_v28  ;;  %1736 = vmatprep.mubr.msk.f32.mxu1 %vm332_vm1, %v1188_v33 }
 0x473   :  { %1737 = vmatmul.mubr.msk.f32.vlgmr.msra.gmra.mrb[10].mxu1 %vm332_vm1, %v1190_v34 }
 0x4ef   :  { %v646_v40 = vpop.xlane.xlu1 %645 }
 0x4f0   :  { %v643_v37 = vpop.xlane.xlu0 %642 }
 0x4f1   :  { %1873 = vrcp.f32 %v643_v37 }
 0x4f4   :  { %v439_v38 = vpop.xlane.xlu0 %438 }
 0x4f5   :  { %1875 = vrcp.f32 %v439_v38 }
 0x4f6   :  { %1877 = vrcp.f32 %v646_v40 }
 0x4f8   :  { %v442_v41 = vpop.xlane.xlu0 %441 }
 0x4f9   :  { %1879 = vrcp.f32 %v442_v41 }
 0x4fb   :  { %v1874_v23 = vpop.eup %1873 }
 0x4ff   :  { %v1876_v44 = vpop.eup %1875 }
 0x500   :  { %v1878_v46 = vpop.eup %1877  ;;  %v532_v49 = vmul.f32 %v1876_v44, %v2360_v62 }
 0x503   :  { %v1880_v50 = vpop.eup %1879 }
 0x504   :  { %v533_v55 = vmul.f32 %v1880_v50, %v2358_v61 }
 0x536   :  { %v1702_v43 = vpop.f32.mrb[6].mxu1 }
 0x537   :  { %v727_v45 = vpop.f32.mrb[7].mxu1  ;;  %v737_v48 = vmul.f32 %v1878_v46, %v1702_v43  ;;  %v331_v43 = vld [vmem:[#allocation13 + $0x18] sm:$0xff] }
 0x538   :  { %v736_v47 = vmul.f32 %v1874_v23, %v727_v45 }
 0x53a   :  { %1705 = vmatprep.mubr.msk.f32.mxu0 %vm332_vm1, %v736_v47 }
 0x53b   :  { %1706 = vmatmul.mubr.msk.f32.vlgmr.msra.gmra.mrb[4].mxu0 %vm332_vm1, %v737_v48 }
 0x53c   :  { %1710 = vmatprep.mubr.msk.f32.mxu0 %vm332_vm1, %v532_v49  ;;  %1709 = vmatpush3.msra.mxu0 %v328_v36 }
 0x53e   :  { %v1719_v51 = vpop.f32.mrb[8].mxu1 }
 0x53f   :  { %v992_v52 = vmul.f32 0.35355338, %v1719_v51  ;;  %v982_v53 = vpop.f32.mrb[9].mxu1 }
 0x540   :  { %v991_v54 = vmul.f32 0.35355338, %v982_v53 }
 0x541   :  { %v994_v56 = vadd.f32 %v992_v52, %v2341_v42  ;;  %v1594_v52 = vld [vmem:[%s2460_s9] ss:$0 sm:$0xff] }
 0x542   :  { %v993_v57 = vadd.f32 %v991_v54, %v2339_v39 }
 0x543   :  { %v998_v58 = vsel %vm424_vm3, %v994_v56, -inf  ;;  %1711 = vmatmul.mubr.msk.f32.vlgmr.msra.gmra.mrb[4].mxu0 %vm332_vm1, %v533_v55 }
 0x544   :  { %999 = vmax.xlane.f32.xlu0 %v998_v58  ;;  %v995_v59 = vsel %vm424_vm3, %v993_v57, -inf }
 0x545   :  { %996 = vmax.xlane.f32.xlu1 %v995_v59 }
 0x546   :  { %v1738_v60 = vpop.f32.mrb[10].mxu1 }
 0x547   :  { %v1279_v62 = vmul.f32 0.35355338, %v1738_v60  ;;  %v1269_v63 = vpop.f32.mrb[11].mxu1 }
 0x548   :  { %v1278_v0 = vmul.f32 0.35355338, %v1269_v63 }
 0x549   :  { %v1281_v1 = vadd.f32 %v1279_v62, %v2341_v42 }
 0x54a   :  { %v1280_v61 = vadd.f32 %v1278_v0, %v2339_v39 }
 0x54b   :  { %v1285_v2 = vsel %vm424_vm3, %v1281_v1, -inf }
 0x54c   :  { %1286 = vmax.xlane.f32.xlu0 %v1285_v2  ;;  %v1282_v3 = vsel %vm424_vm3, %v1280_v61, -inf }
 0x550   :  { %1283 = vmax.xlane.f32.xlu0 %v1282_v3 }
 0x556   :  { %1856 = vrot.lane.b32.xlu1 %v2317_v25, %s2101_s19 }
 0x5d1   :  { %v1000_v4 = vpop.xlane.xlu0 %999 }
 0x5d2   :  { %v1002_v5 = vsub.f32 %v994_v56, %v1000_v4  ;;  %v997_v6 = vpop.xlane.xlu1 %996 }
 0x5d3   :  { %v1001_v7 = vsub.f32 %v993_v57, %v997_v6 }
 0x5d4   :  { %v1005_v8 = vmul.f32 1.442695, %v1002_v5 }
 0x5d5   :  { %v1003_v9 = vmul.f32 1.442695, %v1001_v7 }
 0x5d6   :  { %1881 = vpow2.f32 %v1005_v8  ;;  %v1857_v10 = vpop.permute.xlu1 %1856 }
 0x5d7   :  { %1883 = vpow2.f32 %v1003_v9  ;;  %v1859_v42 = vunpack.i.h.bf16 %v1857_v10  ;;  %v1858_v39 = vunpack.i.l.bf16 %v1857_v10 }
 0x5d9   :  { %v1793_v11 = vpack.c.bf16 %v1859_v42, %v1858_v39  ;;  %v1287_v13 = vpop.xlane.xlu0 %1286  ;;  %v1595_v39 = vld [vmem:[%s2461_s10] ss:$0 sm:$0xff]  ;;  %s2055_s10 = scalar_lea.vmem %s1542_s27, 256 }
 0x5da   :  { %v1289_v27 = vsub.f32 %v1281_v1, %v1287_v13  ;;  %v1596_v13 = vld [vmem:[%s2462_s11] ss:$0 sm:$0xff]  ;;  %p2056_p0 = scmp.ne.s32.totalorder %s1542_s27, %s2055_s10  ;;  %p2061_p2 = scmp.lt.s32.totalorder %s2055_s10, %s2055_s10 }
 0x5db   :  { %1794 = vmatprep.subr.bf16.mxu0 %v1793_v11 }
 0x5dc   :  { %1796 = vmatpush3.bf16.msra.mxu0 %v1793_v11  ;;  %v1292_v28 = vmul.f32 1.442695, %v1289_v27  ;;  %p2062_p3 = por %p2061_p2, %p2060_p1 }
 0x5dd   :  { %v1284_v14 = vpop.xlane.xlu0 %1283  ;;  %1727 = vmatprep.subr.mxu0 %v330_v26 }
 0x5de   :  { %v1288_v16 = vsub.f32 %v1280_v61, %v1284_v14  ;;  %p2063_p4 = pnand %p2062_p3, %p2056_p0 }
 0x5e0   :  { %v1882_v17 = vpop.eup %1881  ;;  %v1290_v18 = vmul.f32 1.442695, %v1288_v16 }
 0x5e1   :  { %v1884_v19 = vpop.eup %1883  ;;  %v1010_v20 = vsel %vm424_vm3, %v1882_v17, 0.0 }
 0x5e2   :  { %1885 = vpow2.f32 %v1290_v18  ;;  %1724 = vmatprep.mubr.msk.f32.mxu0 %vm424_vm3, %v1884_v19  ;;  %1011 = vadd.xlane.f32.xlu0 %v1010_v20  ;;  %v1007_v21 = vsel %vm424_vm3, %v1884_v19, 0.0 }
 0x5e3   :  { %1725 = vmatmul.mubr.msk.f32.vlgmr.msra.gmra.mrb[6].mxu0 %vm424_vm3, %v1882_v17  ;;  %1887 = vpow2.f32 %v1292_v28  ;;  %v1530_v17 = vld [vmem:[#allocation7] sm:$0xff] }
 0x5e4   :  { %1728 = vmatpush3.msra.mxu0 %v330_v26 }
 0x5e6   :  { %1008 = vadd.xlane.f32.xlu0 %v1007_v21 }
 0x5ec   :  { %v1886_v22 = vpop.eup %1885 }
 0x5ed   :  { %v1294_v24 = vsel %vm424_vm3, %v1886_v22, 0.0  ;;  %v1888_v29 = vpop.eup %1887 }
 0x5ee   :  { %1295 = vadd.xlane.f32.xlu1 %v1294_v24  ;;  %v1297_v30 = vsel %vm424_vm3, %v1888_v29, 0.0 }
 0x5fc   :  { %1861 = vrot.lane.b32.xlu0 %v2317_v25, %s2102_s21 }
 0x61b   :  { %1298 = vadd.xlane.f32.xlu0 %v1297_v30 }
 0x66f   :  { %v1012_v31 = vpop.xlane.xlu0 %1011 }
 0x673   :  { %v1009_v32 = vpop.xlane.xlu0 %1008 }
 0x674   :  { %1889 = vrcp.f32 %v1009_v32 }
 0x675   :  { %1891 = vrcp.f32 %v1012_v31 }
 0x677   :  { %v1862_v33 = vpop.permute.xlu0 %1861 }
 0x678   :  { %v1864_v34 = vunpack.i.h.bf16 %v1862_v33  ;;  %v1863_v35 = vunpack.i.l.bf16 %v1862_v33 }
 0x67a   :  { %v1803_v36 = vpack.c.bf16 %v1864_v34, %v1863_v35 }
 0x67b   :  { %v1296_v44 = vpop.xlane.xlu1 %1295 }
 0x67c   :  { %1804 = vmatprep.subr.bf16.mxu0 %v1803_v36  ;;  %1893 = vrcp.f32 %v1296_v44 }
 0x67e   :  { %v1890_v38 = vpop.eup %1889 }
 0x67f   :  { %v1892_v25 = vpop.eup %1891 }
 0x686   :  { %v1894_v47 = vpop.eup %1893 }
 0x6a8   :  { %v1299_v45 = vpop.xlane.xlu0 %1298 }
 0x6a9   :  { %1895 = vrcp.f32 %v1299_v45 }
 0x6b3   :  { %v1896_v49 = vpop.eup %1895 }
 0x6b6   :  { %v1726_v37 = vpop.f32.mrb[6].mxu0 }
 0x6b7   :  { %v1093_v40 = vpop.f32.mrb[7].mxu0  ;;  %v1103_v23 = vmul.f32 %v1892_v25, %v1726_v37 }
 0x6b8   :  { %v1102_v41 = vmul.f32 %v1890_v38, %v1093_v40 }
 0x6ba   :  { %1729 = vmatprep.mubr.msk.f32.mxu0 %vm332_vm1, %v1102_v41 }
 0x6bb   :  { %1730 = vmatmul.mubr.msk.f32.vlgmr.msra.gmra.mrb[4].mxu0 %vm332_vm1, %v1103_v23 }
 0x6bc   :  { %1806 = vmatpush3.bf16.msra.mxu0 %v1803_v36  ;;  %1743 = vmatprep.mubr.msk.f32.mxu0 %vm424_vm3, %v1886_v22  ;;  %v1531_v22 = vld [vmem:[#allocation7 + $0x8] sm:$0xff] }
 0x6bd   :  { %1746 = vmatprep.subr.mxu0 %v331_v43 }
 0x6bf   :  { %1744 = vmatmul.mubr.msk.f32.vlgmr.msra.gmra.mrb[8].mxu0 %vm424_vm3, %v1888_v29 }
 0x6c0   :  { %1747 = vmatpush3.msra.mxu0 %v331_v43 }
 0x792   :  { %v1745_v46 = vpop.f32.mrb[8].mxu0 }
 0x793   :  { %v1380_v48 = vpop.f32.mrb[9].mxu0  ;;  %v1390_v51 = vmul.f32 %v1896_v49, %v1745_v46 }
 0x794   :  { %v1389_v50 = vmul.f32 %v1894_v47, %v1380_v48 }
 0x796   :  { %1748 = vmatprep.mubr.msk.f32.mxu0 %vm332_vm1, %v1389_v50 }
 0x797   :  { %1749 = vmatmul.mubr.msk.f32.vlgmr.msra.gmra.mrb[4].mxu0 %vm332_vm1, %v1390_v51 }
 0x86a   :  { %v1750_v53 = vpop.f32.mrb[4].mxu0 }
 0x86b   :  { %v1463_v54 = vpop.f32.mrb[5].mxu0  ;;  %v1482_v55 = vadd.f32 %v1750_v53, %v1594_v52 }
 0x86c   :  { %v1481_v56 = vadd.f32 %v1594_v52, %v1463_v54 }
 0x86d   :  { %v1484_v59 = vadd.f32 %v1482_v55, %v2300_v15 }
 0x86e   :  { %v1483_v57 = vadd.f32 %v1481_v56, %v2296_v12 }
 0x86f   :  { %v1488_v60 = vsel %vm152_vm0, %v1484_v59, 0.0 }
 0x870   :  { %v1485_v58 = vsel %vm152_vm0, %v1483_v57, 0.0 }
 0x871   :  { %1486 = vadd.xlane.f32.xlu1 %v1485_v58 }
 0x875   :  { %1489 = vadd.xlane.f32.xlu1 %v1488_v60 }
 0x8fe   :  { %v1487_v62 = vpop.xlane.xlu1 %1486 }
 0x8ff   :  { %v1492_v63 = vmul.f32 0.03125, %v1487_v62 }
 0x901   :  { %v1494_v0 = vsub.f32 %v1483_v57, %v1492_v63 }
 0x902   :  { %v1490_v1 = vpop.xlane.xlu1 %1489 }
 0x903   :  { %v1493_v61 = vmul.f32 0.03125, %v1490_v1  ;;  %v1496_v2 = vmul.f32 %v1494_v0, %v1494_v0 }
 0x905   :  { %v1495_v3 = vsub.f32 %v1484_v59, %v1493_v61  ;;  %v1498_v4 = vsel %vm152_vm0, %v1496_v2, 0.0 }
 0x906   :  { %1499 = vadd.xlane.f32.xlu1 %v1498_v4 }
 0x907   :  { %v1497_v5 = vmul.f32 %v1495_v3, %v1495_v3 }
 0x909   :  { %v1501_v12 = vsel %vm152_vm0, %v1497_v5, 0.0 }
 0x90a   :  { %1502 = vadd.xlane.f32.xlu1 %v1501_v12 }
 0x993   :  { %v1500_v6 = vpop.xlane.xlu1 %1499 }
 0x994   :  { %v1504_v15 = vmul.f32 0.03125, %v1500_v6 }
 0x996   :  { %v1506_v7 = vadd.f32 1e-05, %v1504_v15 }
 0x997   :  { %v1503_v8 = vpop.xlane.xlu1 %1502 }
 0x998   :  { %1897 = vrsqrt.f32 %v1506_v7  ;;  %v1505_v9 = vmul.f32 0.03125, %v1503_v8 }
 0x99a   :  { %v1507_v10 = vadd.f32 1e-05, %v1505_v9 }
 0x99c   :  { %1899 = vrsqrt.f32 %v1507_v10 }
 0x9a2   :  { %v1898_v42 = vpop.eup %1897 }
 0x9a3   :  { %v1510_v11 = vmul.f32 %v1898_v42, %v1494_v0 }
 0x9a5   :  { %v1519_v14 = vmul.f32 %v1595_v39, %v1510_v11 }
 0x9a6   :  { %v1900_v16 = vpop.eup %1899 }
 0x9a7   :  { %v1511_v18 = vmul.f32 %v1900_v16, %v1495_v3  ;;  %v1528_v19 = vadd.f32 %v1596_v13, %v1519_v14 }
 0x9a9   :  { %v1520_v20 = vmul.f32 %v1595_v39, %v1511_v18  ;;  %v1532_v21 = vmul.f32 %v1530_v17, %v1528_v19 }
 0x9ab   :  { %v1529_v24 = vadd.f32 %v1596_v13, %v1520_v20  ;;  %1534 = vst.msk [vmem:[#allocation14] sm:$0xff] %vm152_vm0, %v1532_v21 }
 0x9ad   :  { %v1533_v26 = vmul.f32 %v1531_v22, %v1529_v24 }
 0x9af   :  { %1535 = vst.msk [vmem:[#allocation14 + $0x8] sm:$0xff] %vm152_vm0, %v1533_v26 }
 0x9b0   :  { %2066 = shalt.err (!%p2063_p4)
}
 0x9b1   :  { %s2067_s1 = scalar_lea.hbm %s2463_s12, 256 }
 0x9b2   :  { %p2068_p5 = scmp.ne.s32.totalorder %s2463_s12, %s2067_s1  ;;  %p2071_p6 = scmp.lt.u32.totalorder %s2067_s1, %s2463_s12 }
 0x9b4   :  { %p2073_p7 = pnand %p2071_p6, %p2068_p5 }
 0x9b6   :  { %2076 = shalt.err (!%p2073_p7)
}
 0x9b7   :  { %1547 = dma.vmem_to_hbm [thread:$0]  %s1542_s27, 256, %s2463_s12, [#allocation4], %s2089_s15, %s2089_s15, %s2090_s16  }
 0x9b8   :  { %2085 = dma.done.wait [#allocation4], 256  }
 0x9b9   :  { %2086 = vsyncadd [#allocation4], 4294967040 }
 0x9ba   :  { %1551 = vsyncpa [#allocation3], 1 }
 0x9bb   :  { %1552 = vsyncpa [#allocation6], 1 }
 0x9bc   :  { %1553 = vsyncpa [#allocation9], 1 }
 0x9bd   :  { %1554 = vsyncpa [#allocation12], 1 }
 0x9be   :  { %1555 = vsyncpa [#allocation4], 1 }

</bundles_post_ra>
